<compile_context>
chip_gen: v6e
topology: v6e:2x2x1
jax: 0.10.0
libtpu: 0.0.40
codegen_flags: <defaults>
</compile_context>

<pallas_src>
import math

import jax
import jax.numpy as jnp
from jax.experimental import pallas as pl
from jax.experimental.pallas import tpu as pltpu

# ----- module hyperparameters (synthetic config) -----
C_INPUT = 192          # fixed by the module (assert self.c_input == 192)
C_INTERNAL = 128       # config['metadata_encoder']['internal_num_channels']
C_TRUNK = 128          # config['trunk_num_channels']
ACTIVATION = "relu"
OUT_SCALE = 0.5
MASKED_FEATURE = 86


def _gain(activation):
    if activation in ("relu", "hardswish"):
        return math.sqrt(2.0)
    if activation == "elu":
        return math.sqrt(1.55052)
    if activation == "mish":
        return math.sqrt(2.210277)
    if activation == "gelu":
        return math.sqrt(2.351718)
    if activation == "identity":
        return 1.0
    raise ValueError(activation)


def _init_weight(key, shape, activation, scale, fan_in):
    # mirrors init_weights(): trunc_normal(mean=0, std, a=-2std, b=2std)
    gain = _gain(activation)
    target_std = scale * gain / math.sqrt(fan_in)
    std = target_std / 0.8796256610342398
    if std < 1e-10:
        return jnp.zeros(shape, jnp.float32)
    return std * jax.random.truncated_normal(key, -2.0, 2.0, shape, jnp.float32)


def _round_up(n, m):
    return ((n + m - 1) // m) * m


# ----- Pallas kernel: one batch tile; weights/biases VMEM-resident -----
def _meta_encoder_kernel(x_ref, w1_ref, b1_ref, w2_ref, b2_ref, w3_ref,
                         out_ref):
    # x arrives as f32; cast to bf16 here (hidden under DMA). W1 already has
    # the feature mask folded in (row 86 == 0); W3 carries the 0.5 scale.
    x = x_ref[...].astype(jnp.bfloat16)
    h1 = jnp.dot(x, w1_ref[...], preferred_element_type=jnp.float32)
    h1 = jnp.maximum(h1 + b1_ref[...], 0.0)                     # f32 bias+relu
    h2 = jnp.dot(h1.astype(jnp.bfloat16), w2_ref[...],
                 preferred_element_type=jnp.float32)
    h2 = jnp.maximum(h2 + b2_ref[...], 0.0)                     # f32 bias+relu
    out = jnp.dot(h2.astype(jnp.bfloat16), w3_ref[...],
                  preferred_element_type=jnp.float32)
    out_ref[...] = out.astype(out_ref.dtype)


def prepare_params(feature_mask, w1, b1, w2, b2, w3):
    """One-time parameter prep (do at parameter-load time, NOT per forward).

    Folds the feature mask into W1 and the 0.5 output scale into W3
    (mathematically identical to the module), casts weights to bf16 (MXU
    operands), keeps biases f32. Weights in (in, out) layout.
    """
    c_internal = w1.shape[1]
    return {
        "w1": (w1 * feature_mask.reshape(-1, 1)).astype(jnp.bfloat16),
        "b1": b1.reshape(1, c_internal).astype(jnp.float32),
        "w2": w2.astype(jnp.bfloat16),
        "b2": b2.reshape(1, c_internal).astype(jnp.float32),
        "w3": (OUT_SCALE * w3).astype(jnp.bfloat16),
    }


def metadata_encoder_forward(x, params, *, tb=2048, out_dtype=jnp.bfloat16,
                             input_buffers=2):
    """x: (B, 192) f32; params from prepare_params()."""
    batch, c_input = x.shape
    assert c_input == C_INPUT
    w1, b1, w2, b2, w3 = (params["w1"], params["b1"], params["w2"],
                          params["b2"], params["w3"])
    c_internal = w1.shape[1]
    c_trunk = w3.shape[1]

    # Batch tile: large enough to amortize the ~0.35us per-grid-step overhead,
    # but clamped so the grid has >=4 steps whenever the batch allows it --
    # that way the "parallel" axis can be sharded across v7x's two TensorCores
    # and the double-buffer pipeline actually overlaps DMA with compute.
    # Multiple of 16 keeps the bf16 output tile sublane-aligned.
    tb = max(16, min(tb, 4096))
    tb = min(tb, max(16, _round_up(pl.cdiv(batch, 4), 16)))
    grid = (pl.cdiv(batch, tb),)

    flops = 2 * batch * (c_input * c_internal
                         + c_internal * c_internal
                         + c_internal * c_trunk)
    out_bytes = jnp.dtype(out_dtype).itemsize
    bytes_accessed = (batch * c_input * 4                        # x (f32 in)
                      + batch * c_trunk * out_bytes              # out
                      + (c_input * c_internal + c_internal * c_internal
                         + c_internal * c_trunk) * 2             # weights bf16
                      + 2 * c_internal * 4)                      # biases f32

    if input_buffers == 2:
        x_spec = pl.BlockSpec((tb, c_input), lambda i: (i, 0))
    else:
        # Deeper prefetch queue if a profile still shows exposed input DMA.
        x_spec = pl.BlockSpec((tb, c_input), lambda i: (i, 0),
                              pipeline_mode=pl.Buffered(input_buffers))

    return pl.pallas_call(
        _meta_encoder_kernel,
        out_shape=jax.ShapeDtypeStruct((batch, c_trunk), out_dtype),
        grid=grid,
        in_specs=[
            x_spec,                                                  # x tile
            pl.BlockSpec((c_input, c_internal), lambda i: (0, 0)),   # w1 resident
            pl.BlockSpec((1, c_internal), lambda i: (0, 0)),         # b1 resident
            pl.BlockSpec((c_internal, c_internal), lambda i: (0, 0)),  # w2
            pl.BlockSpec((1, c_internal), lambda i: (0, 0)),         # b2
            pl.BlockSpec((c_internal, c_trunk), lambda i: (0, 0)),   # w3
        ],
        out_specs=pl.BlockSpec((tb, c_trunk), lambda i: (i, 0)),
        compiler_params=pltpu.CompilerParams(
            dimension_semantics=("parallel",)),   # megacore split on v7x
        cost_estimate=pl.CostEstimate(flops=flops, transcendentals=0,
                                      bytes_accessed=bytes_accessed),
    )(x, w1, b1, w2, b2, w3)


# ----- references -----
def _reference_forward_f32(x, mask, w1, b1, w2, b2, w3):
    h = x * mask.reshape(1, -1)
    h = jnp.maximum(h @ w1 + b1.reshape(1, -1), 0.0)
    h = jnp.maximum(h @ w2 + b2.reshape(1, -1), 0.0)
    return OUT_SCALE * (h @ w3)


def _reference_forward_bf16(x, mask, w1, b1, w2, b2, w3, out_dtype=jnp.bfloat16):
    # Mirrors the kernel numerics: bf16 MXU operands, f32 accumulation,
    # bf16-rounded output.
    w1f = (w1 * mask.reshape(-1, 1)).astype(jnp.bfloat16)
    w3f = (OUT_SCALE * w3).astype(jnp.bfloat16)
    h = jnp.dot(x.astype(jnp.bfloat16), w1f, preferred_element_type=jnp.float32)
    h = jnp.maximum(h + b1.reshape(1, -1), 0.0)
    h = jnp.dot(h.astype(jnp.bfloat16), w2.astype(jnp.bfloat16),
                preferred_element_type=jnp.float32)
    h = jnp.maximum(h + b2.reshape(1, -1), 0.0)
    out = jnp.dot(h.astype(jnp.bfloat16), w3f,
                  preferred_element_type=jnp.float32)
    return out.astype(out_dtype)


if __name__ == "__main__":
    key = jax.random.PRNGKey(0)
    k_in, k_w1, k_b1, k_w2, k_b2, k_w3 = jax.random.split(key, 6)

    batch = 64                  # small test shape; tb clamps to 16 -> 4 grid steps
    x = jax.random.normal(k_in, (batch, C_INPUT), jnp.float32)

    # feature_mask: 1.0 everywhere except index 86 -> 0.0
    feature_mask = jnp.where(jnp.arange(C_INPUT) == MASKED_FEATURE,
                             0.0, 1.0).astype(jnp.float32)

    weight_scale, bias_scale = 0.8, 0.2
    # weights stored (in, out): fan_in of the PyTorch (out, in) weight == in_features
    w1 = _init_weight(k_w1, (C_INPUT, C_INTERNAL), ACTIVATION, weight_scale, C_INPUT)
    b1 = _init_weight(k_b1, (C_INTERNAL,), ACTIVATION, bias_scale, C_INPUT)
    w2 = _init_weight(k_w2, (C_INTERNAL, C_INTERNAL), ACTIVATION, weight_scale, C_INTERNAL)
    b2 = _init_weight(k_b2, (C_INTERNAL,), ACTIVATION, bias_scale, C_INTERNAL)
    w3 = _init_weight(k_w3, (C_INTERNAL, C_TRUNK), ACTIVATION, weight_scale, C_INTERNAL)

    # Parameter prep is done once (hoisted out of the forward path).
    params = prepare_params(feature_mask, w1, b1, w2, b2, w3)

    out = metadata_encoder_forward(x, params)
    out = jax.block_until_ready(out)
    assert out.shape == (batch, C_TRUNK)
    assert out.dtype == jnp.bfloat16
    out_f32 = out.astype(jnp.float32)

    # Tight check against a reference using the same bf16-MXU / bf16-out numerics.
    ref_bf16 = _reference_forward_bf16(x, feature_mask, w1, b1, w2, b2, w3)
    assert jnp.allclose(out_f32, ref_bf16.astype(jnp.float32),
                        atol=1e-2, rtol=1e-2)

    # Looser check against the full-f32 module semantics (bf16 operand/output error).
    ref_f32 = _reference_forward_f32(x, feature_mask, w1, b1, w2, b2, w3)
    assert jnp.allclose(out_f32, ref_f32, atol=5e-2, rtol=5e-2)

    print("KERNEL_OK")
</pallas_src>

<mosaic_0001>
module attributes {stable_mosaic.version = 11 : i64} {
  func.func @_meta_encoder_kernel(%arg0: i32, %arg1: memref<16x192xf32, #tpu.memory_space<vmem>>, %arg2: memref<192x128xbf16, #tpu.memory_space<vmem>>, %arg3: memref<1x128xf32, #tpu.memory_space<vmem>>, %arg4: memref<128x128xbf16, #tpu.memory_space<vmem>>, %arg5: memref<1x128xf32, #tpu.memory_space<vmem>>, %arg6: memref<128x128xbf16, #tpu.memory_space<vmem>>, %arg7: memref<16x128xbf16, #tpu.memory_space<vmem>>) attributes {dimension_semantics = [#tpu.dimension_semantics<parallel>], iteration_bounds = array<i64: 4>, scalar_prefetch = 0 : i64, scratch_operands = 0 : i64, tpu.core_type = #tpu.core_type<tc>, window_params = [{transform_indices = @transform_0, window_bounds = array<i64: 16, 192>}, {pipeline_mode = #tpu.pipeline_mode<synchronous>, transform_indices = @transform_1, window_bounds = array<i64: 192, 128>}, {pipeline_mode = #tpu.pipeline_mode<synchronous>, transform_indices = @transform_2, window_bounds = array<i64: 1, 128>}, {pipeline_mode = #tpu.pipeline_mode<synchronous>, transform_indices = @transform_3, window_bounds = array<i64: 128, 128>}, {pipeline_mode = #tpu.pipeline_mode<synchronous>, transform_indices = @transform_4, window_bounds = array<i64: 1, 128>}, {pipeline_mode = #tpu.pipeline_mode<synchronous>, transform_indices = @transform_5, window_bounds = array<i64: 128, 128>}, {transform_indices = @transform_6, window_bounds = array<i64: 16, 128>}]} {
    %c0 = arith.constant 0 : index
    %c0_0 = arith.constant 0 : index
    %0 = vector.load %arg1[%c0, %c0_0] : memref<16x192xf32, #tpu.memory_space<vmem>>, vector<16x192xf32>
    %1 = arith.truncf %0 : vector<16x192xf32> to vector<16x192xbf16>
    %c0_1 = arith.constant 0 : index
    %c0_2 = arith.constant 0 : index
    %2 = vector.load %arg2[%c0_1, %c0_2] : memref<192x128xbf16, #tpu.memory_space<vmem>>, vector<192x128xbf16>
    %cst = arith.constant dense<0.000000e+00> : vector<16x128xf32>
    %3 = tpu.matmul %1, %2, %cst {dimension_numbers = #tpu.dot_dimension_numbers<[1], [0], [0], [1], [0, 0, 1, 1], [], []>} : vector<16x192xbf16>, vector<192x128xbf16>, vector<16x128xf32> -> vector<16x128xf32>
    %c0_3 = arith.constant 0 : index
    %c0_4 = arith.constant 0 : index
    %4 = vector.load %arg3[%c0_3, %c0_4] : memref<1x128xf32, #tpu.memory_space<vmem>>, vector<1x128xf32>
    %5 = vector.broadcast %4 : vector<1x128xf32> to vector<16x128xf32>
    %6 = arith.addf %3, %5 : vector<16x128xf32>
    %cst_5 = arith.constant 0.000000e+00 : f32
    %7 = vector.broadcast %cst_5 : f32 to vector<16x128xf32>
    %8 = arith.maximumf %6, %7 : vector<16x128xf32>
    %9 = arith.truncf %8 : vector<16x128xf32> to vector<16x128xbf16>
    %c0_6 = arith.constant 0 : index
    %c0_7 = arith.constant 0 : index
    %10 = vector.load %arg4[%c0_6, %c0_7] : memref<128x128xbf16, #tpu.memory_space<vmem>>, vector<128x128xbf16>
    %cst_8 = arith.constant dense<0.000000e+00> : vector<16x128xf32>
    %11 = tpu.matmul %9, %10, %cst_8 {dimension_numbers = #tpu.dot_dimension_numbers<[1], [0], [0], [1], [0, 0, 1, 1], [], []>} : vector<16x128xbf16>, vector<128x128xbf16>, vector<16x128xf32> -> vector<16x128xf32>
    %c0_9 = arith.constant 0 : index
    %c0_10 = arith.constant 0 : index
    %12 = vector.load %arg5[%c0_9, %c0_10] : memref<1x128xf32, #tpu.memory_space<vmem>>, vector<1x128xf32>
    %13 = vector.broadcast %12 : vector<1x128xf32> to vector<16x128xf32>
    %14 = arith.addf %11, %13 : vector<16x128xf32>
    %cst_11 = arith.constant 0.000000e+00 : f32
    %15 = vector.broadcast %cst_11 : f32 to vector<16x128xf32>
    %16 = arith.maximumf %14, %15 : vector<16x128xf32>
    %17 = arith.truncf %16 : vector<16x128xf32> to vector<16x128xbf16>
    %c0_12 = arith.constant 0 : index
    %c0_13 = arith.constant 0 : index
    %18 = vector.load %arg6[%c0_12, %c0_13] : memref<128x128xbf16, #tpu.memory_space<vmem>>, vector<128x128xbf16>
    %cst_14 = arith.constant dense<0.000000e+00> : vector<16x128xf32>
    %19 = tpu.matmul %17, %18, %cst_14 {dimension_numbers = #tpu.dot_dimension_numbers<[1], [0], [0], [1], [0, 0, 1, 1], [], []>} : vector<16x128xbf16>, vector<128x128xbf16>, vector<16x128xf32> -> vector<16x128xf32>
    %20 = arith.truncf %19 : vector<16x128xf32> to vector<16x128xbf16>
    %c0_15 = arith.constant 0 : index
    %c0_16 = arith.constant 0 : index
    %21 = vector.load %arg7[%c0_15, %c0_16] : memref<16x128xbf16, #tpu.memory_space<vmem>>, vector<16x128xbf16>
    tpu.vector_store %arg7[%c0_15, %c0_16], %20 {strides = array<i32>} : memref<16x128xbf16, #tpu.memory_space<vmem>>, vector<16x128xbf16>,
    return
  }
  func.func @transform_0(%arg0: i32) -> (i32, i32) {
    %c0_i32 = arith.constant 0 : i32
    %c0_i32_0 = arith.constant 0 : i32
    return %arg0, %c0_i32 : i32, i32
  }
  func.func @transform_1(%arg0: i32) -> (i32, i32) {
    %c0_i32 = arith.constant 0 : i32
    %c0_i32_0 = arith.constant 0 : i32
    %c0_i32_1 = arith.constant 0 : i32
    return %c0_i32, %c0_i32_0 : i32, i32
  }
  func.func @transform_2(%arg0: i32) -> (i32, i32) {
    %c0_i32 = arith.constant 0 : i32
    %c0_i32_0 = arith.constant 0 : i32
    %c0_i32_1 = arith.constant 0 : i32
    return %c0_i32, %c0_i32_0 : i32, i32
  }
  func.func @transform_3(%arg0: i32) -> (i32, i32) {
    %c0_i32 = arith.constant 0 : i32
    %c0_i32_0 = arith.constant 0 : i32
    %c0_i32_1 = arith.constant 0 : i32
    return %c0_i32, %c0_i32_0 : i32, i32
  }
  func.func @transform_4(%arg0: i32) -> (i32, i32) {
    %c0_i32 = arith.constant 0 : i32
    %c0_i32_0 = arith.constant 0 : i32
    %c0_i32_1 = arith.constant 0 : i32
    return %c0_i32, %c0_i32_0 : i32, i32
  }
  func.func @transform_5(%arg0: i32) -> (i32, i32) {
    %c0_i32 = arith.constant 0 : i32
    %c0_i32_0 = arith.constant 0 : i32
    %c0_i32_1 = arith.constant 0 : i32
    return %c0_i32, %c0_i32_0 : i32, i32
  }
  func.func @transform_6(%arg0: i32) -> (i32, i32) {
    %c0_i32 = arith.constant 0 : i32
    %c0_i32_0 = arith.constant 0 : i32
    return %arg0, %c0_i32 : i32, i32
  }
}

</mosaic_0001>

<bundles_post_ra>
// kernel: tpu_custom_call.1
= control target key start
LH: loop header
LB: loop body
LE: loop exit
PB: predicated region body
PF: predicated region fallthrough
CT: control target
= control target key end

     0   :  { %11 = vsyncpa [#allocation3], 0  ;;  %s1517_s0 = inlined_call_operand.hbm [shape: f32[64,192], index: 0, kind: input, shape index: {}]   ;;  %s1518_s1 = inlined_call_operand.hbm [shape: bf16[192,128], index: 1, kind: input, shape index: {}]   ;;  %s1519_s2 = inlined_call_operand.vmem [shape: f32[1,128], index: 2, kind: input, shape index: {}]   ;;  %s1520_s3 = inlined_call_operand.hbm [shape: bf16[128,128], index: 3, kind: input, shape index: {}]   ;;  %s1521_s4 = inlined_call_operand.vmem [shape: f32[1,128], index: 4, kind: input, shape index: {}]   ;;  %s1522_s5 = inlined_call_operand.hbm [shape: bf16[128,128], index: 5, kind: input, shape index: {}]   ;;  %s1523_s6 = inlined_call_operand.hbm [shape: bf16[64,128], index: 6, kind: output, shape index: {}]  }
   0x1   :  { %13 = vsyncpa [#allocation3 + $0x1], 0 }
   0x2   :  { %14 = vsyncpa [#allocation6], 0 }
   0x3   :  { %15 = vsyncpa [#allocation9], 0 }
   0x4   :  { %16 = vsyncpa [#allocation4], 0 }
   0x5   :  { %18 = vsyncpa [#allocation4 + $0x1], 0  ;;  %s1286_s21 = smov 0   ;;  %s1288_s22 = smov 0  }
   0x6   :  { %s1290_s23 = smov 0   ;;  %s1292_s24 = smov 0  }
   0x7 LB: > { %s1307_s25 = sadd.s32 4294967295, %s1235_s24   ;;  %s821_s26 = sadd.s32 4294967294, %s1235_s24   ;;  %s1235_s24 = sphi %s1292_s24, %s1546_s24   ;;  %s1231_s23 = sphi %s1290_s23, %s1545_s23   ;;  %s1227_s22 = sphi %s1288_s22, %s1544_s22   ;;  %s1223_s21 = sphi %s1286_s21, %s1543_s21  }
   0x8   : > { %p44_p0 = scmp.ne.s32.totalorder %s1227_s22, %s1223_s21  ;;  %p1524_p1 = scmp.eq.s32.totalorder %s1307_s25, 0 }
   0x9   : > { %p179_p3 = scmp.eq.s32.totalorder %s821_s26, 3  ;;  %p822_p5 = scmp.ge.s32.totalorder %s1235_s24, 1 }
   0xa   : > { %p1316_p4 = por %p1524_p1, %p44_p0  ;;  %p186_p7 = scmp.lt.s32.totalorder %s1235_s24, 5 }
   0xb   : > { %p1321_p6 = por %p179_p3, %p44_p0  ;;  %s1237_s30 = smov [#allocation5]  }
   0xc   : > { %s1528_s27 = scalar_select %p1316_p4, 1, 0 }
   0xd   : > { %s1529_s28 = scalar_select %p1321_p6, 1, 0 }
   0xe   : > { %p1326_p8 = pnand %p822_p5, %p186_p7  ;;  %s198_s7 = sshll.u32 %s1237_s30, 4  ;;  %s199_s7 = int_to_ptr.vmem [resolvable:$true] %s198_s7 }
   0xf   : > { %s1238_s9 = smov [#allocation7]   ;;  %s1239_s11 = smov [#allocation8]  }
  0x10   : > { %s1530_s29 = scalar_select %p1326_p8, 1, 0 }
  0x11   : > { %p959_p9 = pneg %p1326_p8  ;;  %s214_s10 = sshll.u32 %s1238_s9, 4  ;;  %s215_s10 = int_to_ptr.vmem [resolvable:$true] %s214_s10 }
  0x12   : > { %s230_s12 = sshll.u32 %s1239_s11, 4  ;;  %s1068_s13 = scalar_lea.vmem %s199_s7, 1536  ;;  %s231_s12 = int_to_ptr.vmem [resolvable:$true] %s230_s12 }
  0x13   : > { %p1334_p10 = pnand %p959_p9, %p1524_p1  ;;  %p1069_p12 = scmp.ne.s32.totalorder %s199_s7, %s1068_s13 }
  0x14   : > { %p1076_p3 = scmp.lt.s32.totalorder %s199_s7, %s199_s7  ;;  %p1077_p5 = scmp.lt.s32.totalorder %s1068_s13, %s1068_s13 }
  0x15   : > { %p1059_p11 = pneg %p1334_p10 }
  0x16   : > { %p1078_p7 = por %p1077_p5, %p1076_p3 }
  0x17   : > { %p1071_p13 = pnand %p1069_p12, %p1059_p11 }
  0x19   : > { %p1072_p0 = pneg %p1071_p13 }
  0x1b   : > { %p1079_p9 = pnand %p1078_p7, %p1072_p0 }
  0x1d   : > { %1082 = shalt.err (!%p1079_p9)
}
  0x1e   : > { %s1240_s14 = smov 64   ;;  %s1241_s15 = smov 4  }
  0x1f   : > { %962 = dma.hbm_to_vmem [thread:$0]  (!%p1334_p10), %s1518_s1, 1536, %s199_s7, [#allocation6], %s1240_s14, %s1240_s14, %s1241_s15  }
  0x20   : > { %s1094_s18 = scalar_lea.vmem %s215_s10, 1024  ;;  %p1102_p2 = scmp.lt.s32.totalorder %s215_s10, %s215_s10 }
  0x21   : > { %p1095_p1 = scmp.ne.s32.totalorder %s215_s10, %s1094_s18  ;;  %p1103_p6 = scmp.lt.s32.totalorder %s1094_s18, %s1094_s18 }
  0x23   : > { %p1097_p12 = pnand %p1095_p1, %p1059_p11  ;;  %p1104_p3 = por %p1103_p6, %p1102_p2 }
  0x25   : > { %p1098_p13 = pneg %p1097_p12 }
  0x27   : > { %p1105_p0 = pnand %p1104_p3, %p1098_p13 }
  0x29   : > { %1108 = shalt.err (!%p1105_p0)
}
  0x2a   : > { %965 = dma.hbm_to_vmem [thread:$0]  (!%p1334_p10), %s1520_s3, 1024, %s215_s10, [#allocation6], %s1240_s14, %s1240_s14, %s1241_s15  }
  0x2b   : > { %s1120_s26 = scalar_lea.vmem %s231_s12, 1024  ;;  %p1128_p9 = scmp.lt.s32.totalorder %s231_s12, %s231_s12 }
  0x2c   : > { %p1121_p5 = scmp.ne.s32.totalorder %s231_s12, %s1120_s26  ;;  %p1129_p12 = scmp.lt.s32.totalorder %s1120_s26, %s1120_s26 }
  0x2e   : > { %p1123_p7 = pnand %p1121_p5, %p1059_p11  ;;  %p1130_p4 = por %p1129_p12, %p1128_p9 }
  0x30   : > { %p1124_p1 = pneg %p1123_p7 }
  0x32   : > { %p1131_p2 = pnand %p1130_p4, %p1124_p1 }
  0x34   : > { %1134 = shalt.err (!%p1131_p2)
}
  0x35   : > { %968 = dma.hbm_to_vmem [thread:$0]  (!%p1334_p10), %s1522_s5, 1024, %s231_s12, [#allocation9], %s1240_s14, %s1240_s14, %s1241_s15  }
  0x36   : > { %s1365_s9 = sadd.s32 1, %s1235_s24   ;;  %s31_s8 = sadd.s32 1, %s1231_s23 }
  0x37   : > { %s28_s10 = ssub.s32 %s1235_s24, %s1365_s9  ;;  %p38_p6 = scmp.ne.s32.totalorder %s1231_s23, %s1227_s22 }
  0x38   : > { %p29_p4 = scmp.eq.s32.totalorder %s28_s10, 0  ;;  %p39_p11 = scmp.eq.s32.totalorder %s1235_s24, 0 }
  0x39   : > { %p980_p13 = scmp.lt.s32.totalorder %s1235_s24, 4  ;;  %p1532_p0 = scmp.eq.s32.totalorder %s1307_s25, 3 }
  0x3a   : > { %s1375_s11 = scalar_select %p29_p4, %s1231_s23, %s31_s8  }
  0x3b   : > { %p40_p3 = por %p39_p11, %p38_p6  ;;  %p1379_p5 = por %p1532_p0, %p38_p6 }
  0x3c   : > { %s244_s16 = sand.u32 1, %s1231_s23   ;;  %s876_s17 = sshll.u32 %s1235_s24, 9 }
  0x3d   : > { %s1533_s13 = scalar_select %p1379_p5, 1, 0 }
  0x3e   : > { %s827_s12 = sshll.u32 %s244_s16, 5  ;;  %s1388_s18 = scalar_lea.hbm %s1517_s0, %s876_s17 }
  0x3f   : > { %s248_s19 = scalar_lea.vmem [#allocation2], %s827_s12  ;;  %p1390_p10 = pnand %p980_p13, %p40_p3 }
  0x40   : > { %s256_s20 = sshll.u32 %s248_s19, 4  ;;  %s1396_s30 = scalar_lea.sflag [#allocation3], %s244_s16  ;;  %s1394_s20 = int_to_ptr.vmem [resolvable:$true] %s256_s20 }
  0x41   : > { %s1135_s7 = scalar_lea.hbm %s1388_s18, 512  ;;  %p1137_p1 = pneg %p1390_p10 }
  0x42   : > { %p1136_p7 = scmp.ne.s32.totalorder %s1388_s18, %s1135_s7  ;;  %s1140_s17 = scalar_lea.hbm %s1517_s0, 2048 }
  0x43   : > { %p1141_p2 = scmp.lt.s32.totalorder %s1388_s18, %s1517_s0  ;;  %p1142_p4 = scmp.lt.s32.totalorder %s1140_s17, %s1135_s7 }
  0x44   : > { %p1138_p9 = pnand %p1137_p1, %p1136_p7 }
  0x45   : > { %p1143_p6 = por %p1142_p4, %p1141_p2 }
  0x46   : > { %p1139_p12 = pneg %p1138_p9 }
  0x48   : > { %p1144_p11 = pnand %p1143_p6, %p1139_p12 }
  0x4a   : > { %1147 = shalt.err (!%p1144_p11)
}
  0x4b   : > { %s1148_s16 = scalar_lea.vmem %s1394_s20, 512  ;;  %s1242_s15 = smov [#allocation2]  }
  0x4c   : > { %p1149_p13 = scmp.ne.s32.totalorder %s1394_s20, %s1148_s16  ;;  %s1153_s19 = sshll.u32 %s1242_s15, 4  ;;  %s1154_s19 = int_to_ptr.vmem [resolvable:$false] %s1153_s19 }
  0x4d   : > { %s1155_s10 = scalar_lea.vmem %s1154_s19, 1024  ;;  %p1156_p7 = scmp.lt.s32.totalorder %s1394_s20, %s1154_s19 }
  0x4e   : > { %p1151_p3 = pnand %p1149_p13, %p1137_p1  ;;  %p1157_p9 = scmp.lt.s32.totalorder %s1155_s10, %s1148_s16 }
  0x50   : > { %p1152_p0 = pneg %p1151_p3  ;;  %p1158_p5 = por %p1157_p9, %p1156_p7 }
  0x52   : > { %p1159_p8 = pnand %p1158_p5, %p1152_p0 }
  0x54   : > { %1162 = shalt.err (!%p1159_p8)
}
  0x55   : > { %s1243_s7 = smov 256   ;;  %s1244_s8 = smov 16  }
  0x56   : > { %972 = dma.hbm_to_vmem [thread:$0]  (!%p1390_p10), %s1388_s18, 512, %s1394_s20, %s1396_s30, %s1243_s7, %s1243_s7, %s1244_s8  }
  0x57   : > { %p1535_p1 = scmp.ne.s32.totalorder %s1530_s29, 0 }
  0x58   : > { %s1420_s17 = sand.u32 (!%p1535_p1), 1, %s1227_s22   ;;  %p1536_p8 = scmp.ne.s32.totalorder (!%p1535_p1), %s1528_s27, 0 }
  0x59   : > { %268 = sbr.rel (%p1535_p1) target bundleno = 769 (0x301), region = 44  ;;  %s832_s12 = sshll.u32 (!%p1535_p1), %s1420_s17, 5 }
  0x5a   : > { %s271_s14 = scalar_lea.sflag (!%p1535_p1), [#allocation3], %s1420_s17  ;;  %s1424_s16 = scalar_lea.vmem (!%p1535_p1), [#allocation2], %s832_s12 }
  0x5e   : > { %1206 = dma.done.wait (%p1536_p8), %s271_s14, 512  }
  0x5f   : > { %1208 = vsyncadd (%p1536_p8), %s271_s14, 4294966784  ;;  %p1537_p5 = scmp.eq.s32.totalorder %s1307_s25, 0 }
  0x61   : > { %1210 = dma.done.wait (%p1537_p5), [#allocation6], 2560   ;;  %p1538_p10 = pmov %p1537_p5 }
  0x62   : > { %p1539_p12 = pmov %p1537_p5 }
  0x63   : > { %1212 = vsyncadd (%p1538_p10), [#allocation6], 4294964736 }
  0x64   : > { %1214 = dma.done.wait (%p1539_p12), [#allocation9], 1024   ;;  %p1540_p2 = pmov %p1537_p5 }
  0x65   : > { %v1245_v0 = vmov 0   ;;  %v1246_v1 = vmov 0.0   ;;  %v1029_v2 = vld [vmem:[#allocation5 + $0x38] sm:$0xff]   ;;  %v1030_v3 = vld [vmem:[#allocation5 + $0x30] sm:$0xff]   ;;  %v1031_v4 = vld [vmem:[#allocation5 + $0x28] sm:$0xff]   ;;  %vm427_vm0 = vcmask 523264  }
  0x66   : > { %1216 = vsyncadd (%p1540_p2), [#allocation9], 4294966272  ;;  %431 = vmatprep.subr.bf16.mxu0 %v1245_v0  ;;  %903 = vmatprep.subr.bf16.mxu1 %v1246_v1  ;;  %v1032_v5 = vld [vmem:[#allocation5 + $0x20] sm:$0xff]   ;;  %v319_v6 = vld [vmem:[%s1424_s16 + $0x8] sm:$0xff]  ;;  %vm1247_vm1 = vmmov 0   ;;  %s836_s26 = sshll.u32 %s1420_s17, 3 }
  0x67   : > { %432 = vmatpush1.bf16.msra.mxu0 %v1029_v2  ;;  %v321_v7 = vld [vmem:[%s1424_s16 + $0x18] sm:$0xff]  ;;  %v1042_v11 = vld [vmem:[#allocation7 + $0x30] sm:$0xff]   ;;  %v1043_v13 = vld [vmem:[#allocation7 + $0x28] sm:$0xff]   ;;  %919 = vmatprep.mubr.msk.bf16.mxu1 %vm1247_vm1, %v1246_v1  ;;  %s314_s30 = scalar_lea.vmem [#allocation10], %s836_s26  ;;  %s879_s19 = sshll.u32 %s1307_s25, 7 }
  0x68   : > { %433 = vmatprep.subr.bf16.mxu0 %v1245_v0  ;;  %v1033_v8 = vld [vmem:[#allocation5 + $0x18] sm:$0xff]   ;;  %v323_v9 = vpack.c.bf16 %v321_v7, %v319_v6  ;;  %v1034_v12 = vld [vmem:[#allocation5 + $0x10] sm:$0xff]   ;;  %v1035_v14 = vld [vmem:[#allocation5 + $0x8] sm:$0xff]   ;;  %s719_s15 = sshll.u32 %s314_s30, 4  ;;  %s1475_s8 = scalar_lea.hbm %s1523_s6, %s879_s19  ;;  %s1470_s15 = int_to_ptr.vmem [resolvable:$true] %s719_s15 }
  0x69   : > { %v1041_v10 = vld [vmem:[#allocation7 + $0x38] sm:$0xff]   ;;  %v1044_v15 = vld [vmem:[#allocation7 + $0x20] sm:$0xff]   ;;  %v1038_v19 = vld [vmem:[#allocation5 + $0x50] sm:$0xff]   ;;  %s706_s12 = scalar_lea.sflag [#allocation4], %s1420_s17  ;;  %s1163_s14 = scalar_lea.vmem %s1470_s15, 128 }
  0x6a   : > { %850 = vmatprep.mubr.msk.bf16.mxu0 %vm427_vm0, %v323_v9  ;;  %904 = vmatpush3.bf16.msra.mxu1 %v1041_v10  ;;  %v1036_v16 = vld [vmem:[#allocation5] sm:$0xff]   ;;  %v1045_v17 = vld [vmem:[#allocation7 + $0x18] sm:$0xff]   ;;  %v1039_v20 = vld [vmem:[#allocation5 + $0x48] sm:$0xff]   ;;  %p1164_p4 = scmp.ne.s32.totalorder %s1470_s15, %s1163_s14  ;;  %p1541_p6 = scmp.ne.s32.totalorder %s1533_s13, 0 }
  0x6b   : > { %434 = vmatpush1.bf16.msra.mxu0 %v1030_v3  ;;  %905 = vmatprep.subr.bf16.mxu1 %v1246_v1  ;;  %v1037_v18 = vld [vmem:[#allocation5 + $0x58] sm:$0xff]   ;;  %v1040_v21 = vld [vmem:[#allocation5 + $0x40] sm:$0xff]   ;;  %v320_v23 = vld [vmem:[%s1424_s16 + $0x10] sm:$0xff]  ;;  %s1248_s25 = smov [#allocation10]  }
  0x6c   : > { %435 = vmatprep.subr.bf16.mxu0 %v1245_v0  ;;  %v318_v22 = vld [vmem:[%s1424_s16] sm:$0xff]  ;;  %v1046_v25 = vld [vmem:[#allocation7 + $0x10] sm:$0xff]   ;;  %v1047_v26 = vld [vmem:[#allocation7 + $0x8] sm:$0xff]   ;;  %p1165_p11 = pnand %p1164_p4, %p1541_p6  ;;  %s1167_s16 = sshll.u32 %s1248_s25, 4  ;;  %s1168_s16 = int_to_ptr.vmem [resolvable:$false] %s1167_s16 }
  0x6d   : > { %v322_v24 = vpack.c.bf16 %v320_v23, %v318_v22  ;;  %v1048_v27 = vld [vmem:[#allocation7] sm:$0xff]   ;;  %v1049_v37 = vld [vmem:[#allocation8 + $0x38] sm:$0xff]   ;;  %v1050_v39 = vld [vmem:[#allocation8 + $0x30] sm:$0xff]   ;;  %s1169_s27 = scalar_lea.vmem %s1168_s16, 256  ;;  %p1170_p3 = scmp.lt.s32.totalorder %s1470_s15, %s1168_s16 }
  0x6e   : > { %906 = vmatpush3.bf16.msra.mxu1 %v1042_v11  ;;  %v837_v28 = vld [vmem:[%s1519_s2] ss:$0 sm:$0xff]  ;;  %v1051_v40 = vld [vmem:[#allocation8 + $0x28] sm:$0xff]   ;;  %v1053_v42 = vld [vmem:[#allocation8 + $0x18] sm:$0xff]   ;;  %p1166_p13 = pneg %p1165_p11  ;;  %p1171_p0 = scmp.lt.s32.totalorder %s1169_s27, %s1163_s14 }
  0x6f   : > { %436 = vmatpush1.bf16.msra.mxu0 %v1031_v4  ;;  %907 = vmatprep.subr.bf16.mxu1 %v1246_v1  ;;  %v1052_v41 = vld [vmem:[#allocation8 + $0x20] sm:$0xff]   ;;  %v1054_v43 = vld [vmem:[#allocation8 + $0x10] sm:$0xff]   ;;  %v1055_v44 = vld [vmem:[#allocation8 + $0x8] sm:$0xff]  }
  0x70   : > { %437 = vmatprep.subr.bf16.mxu0 %v1245_v0  ;;  %v1056_v45 = vld [vmem:[#allocation8] sm:$0xff]   ;;  %p1172_p7 = por %p1171_p0, %p1170_p3 }
  0x71   : > { %v851_v46 = vld [vmem:[%s1521_s4] ss:$0 sm:$0xff] }
  0x72   : > { %908 = vmatpush3.bf16.msra.mxu1 %v1043_v13  ;;  %p1173_p9 = pnand %p1172_p7, %p1166_p13 }
  0x73   : > { %438 = vmatpush1.bf16.msra.mxu0 %v1032_v5  ;;  %909 = vmatprep.subr.bf16.mxu1 %v1246_v1 }
  0x74   : > { %439 = vmatprep.subr.bf16.mxu0 %v1245_v0 }
  0x76   : > { %910 = vmatpush3.bf16.msra.mxu1 %v1044_v15 }
  0x77   : > { %440 = vmatpush1.bf16.msra.mxu0 %v1033_v8  ;;  %911 = vmatprep.subr.bf16.mxu1 %v1246_v1 }
  0x78   : > { %441 = vmatprep.subr.bf16.mxu0 %v1245_v0 }
  0x7a   : > { %912 = vmatpush3.bf16.msra.mxu1 %v1045_v17 }
  0x7b   : > { %442 = vmatpush1.bf16.msra.mxu0 %v1034_v12  ;;  %913 = vmatprep.subr.bf16.mxu1 %v1246_v1 }
  0x7c   : > { %443 = vmatprep.subr.bf16.mxu0 %v1245_v0 }
  0x7e   : > { %914 = vmatpush3.bf16.msra.mxu1 %v1046_v25 }
  0x7f   : > { %444 = vmatpush1.bf16.msra.mxu0 %v1035_v14  ;;  %915 = vmatprep.subr.bf16.mxu1 %v1246_v1 }
  0x80   : > { %445 = vmatprep.subr.bf16.mxu0 %v1245_v0 }
  0x82   : > { %916 = vmatpush3.bf16.msra.mxu1 %v1047_v26 }
  0x83   : > { %446 = vmatpush1.bf16.msra.mxu0 %v1036_v16  ;;  %917 = vmatprep.subr.bf16.mxu1 %v1246_v1 }
  0x84   : > { %455 = vmatprep.subr.bf16.mxu0 %v1245_v0 }
  0x86   : > { %918 = vmatpush3.bf16.msra.mxu1 %v1048_v27 }
  0x87   : > { %456 = vmatpush2.bf16.msra.mxu0 %v1037_v18  ;;  %923 = vmatprep.subr.bf16.mxu1 %v1246_v1 }
  0x88   : > { %457 = vmatprep.subr.bf16.mxu0 %v1245_v0 }
  0x8b   : > { %458 = vmatpush2.bf16.msra.mxu0 %v1038_v19 }
  0x8c   : > { %459 = vmatprep.subr.bf16.mxu0 %v1245_v0 }
  0x8f   : > { %460 = vmatpush2.bf16.msra.mxu0 %v1039_v20 }
  0x90   : > { %461 = vmatprep.subr.bf16.mxu0 %v1245_v0 }
  0x93   : > { %462 = vmatpush2.bf16.msra.mxu0 %v1040_v21 }
  0x96   : > { %464 = vmatmul.mubr.bf16.vlgmr.msra.gmra.mxu0 %v322_v24 }
 0x156   : > { %v465_v29 = vpop.f32.mrf.mxu0 }
 0x157   : > { %v466_v31 = vadd.f32 %v837_v28, %v465_v29 }
 0x158   : > { %v467_v30 = vpop.f32.mrf.mxu0 }
 0x159   : > { %v472_v35 = vmax.f32 %v466_v31, 0.0 }
 0x15a   : > { %v468_v32 = vpop.f32.mrf.mxu0 }
 0x15b   : > { %v469_v33 = vadd.f32 %v837_v28, %v468_v32 }
 0x15c   : > { %v470_v34 = vpop.f32.mrf.mxu0 }
 0x15d   : > { %v473_v36 = vmax.f32 %v469_v33, 0.0 }
 0x15f   : > { %v474_v38 = vpack.c.bf16 %v473_v36, %v472_v35 }
 0x161   : > { %920 = vmatmul.mubr.bf16.vlgmr.msra.gmra.mxu1 %v474_v38 }
 0x162   : > { %924 = vmatpush3.bf16.msra.mxu1 %v1049_v37  ;;  %939 = vmatprep.mubr.msk.bf16.mxu1 %vm1247_vm1, %v1246_v1 }
 0x163   : > { %925 = vmatprep.subr.bf16.mxu1 %v1246_v1 }
 0x166   : > { %926 = vmatpush3.bf16.msra.mxu1 %v1050_v39 }
 0x167   : > { %927 = vmatprep.subr.bf16.mxu1 %v1246_v1 }
 0x16a   : > { %928 = vmatpush3.bf16.msra.mxu1 %v1051_v40 }
 0x16b   : > { %929 = vmatprep.subr.bf16.mxu1 %v1246_v1 }
 0x16e   : > { %930 = vmatpush3.bf16.msra.mxu1 %v1052_v41 }
 0x16f   : > { %931 = vmatprep.subr.bf16.mxu1 %v1246_v1 }
 0x172   : > { %932 = vmatpush3.bf16.msra.mxu1 %v1053_v42 }
 0x173   : > { %933 = vmatprep.subr.bf16.mxu1 %v1246_v1 }
 0x176   : > { %934 = vmatpush3.bf16.msra.mxu1 %v1054_v43 }
 0x177   : > { %935 = vmatprep.subr.bf16.mxu1 %v1246_v1 }
 0x17a   : > { %936 = vmatpush3.bf16.msra.mxu1 %v1055_v44 }
 0x17b   : > { %937 = vmatprep.subr.bf16.mxu1 %v1246_v1 }
 0x17e   : > { %938 = vmatpush3.bf16.msra.mxu1 %v1056_v45 }
 0x221   : > { %v580_v47 = vpop.f32.mrf.mxu1 }
 0x222   : > { %v581_v49 = vadd.f32 %v851_v46, %v580_v47 }
 0x223   : > { %v921_v48 = vpop.f32.mrf.mxu1 }
 0x224   : > { %v587_v53 = vmax.f32 %v581_v49, 0.0 }
 0x225   : > { %v583_v50 = vpop.f32.mrf.mxu1 }
 0x226   : > { %v584_v51 = vadd.f32 %v851_v46, %v583_v50 }
 0x227   : > { %v922_v52 = vpop.f32.mrf.mxu1 }
 0x228   : > { %v588_v54 = vmax.f32 %v584_v51, 0.0 }
 0x22a   : > { %v589_v55 = vpack.c.bf16 %v588_v54, %v587_v53 }
 0x22c   : > { %940 = vmatmul.mubr.bf16.vlgmr.msra.gmra.mxu1 %v589_v55 }
 0x2ec   : > { %v688_v56 = vpop.f32.mrf.mxu1 }
 0x2ee   : > { %v941_v57 = vpop.f32.mrf.mxu1 }
 0x2f0   : > { %v691_v58 = vpop.f32.mrf.mxu1 }
 0x2f1   : > { %v883_v59 = vpack.c.bf16 %v691_v58, %v688_v56 }
 0x2f2   : > { %v942_v60 = vpop.f32.mrf.mxu1 }
 0x2f3   : > { %884 = vst [vmem:[%s314_s30] sm:$0xff] %v883_v59  }
 0x2f4   : > { %1176 = shalt.err (!%p1173_p9)
}
 0x2f5   : > { %s1177_s29 = scalar_lea.hbm %s1475_s8, 128  ;;  %s1181_s26 = scalar_lea.hbm %s1523_s6, 512 }
 0x2f6   : > { %p1178_p1 = scmp.ne.s32.totalorder %s1475_s8, %s1177_s29  ;;  %p1182_p10 = scmp.lt.s32.totalorder %s1475_s8, %s1523_s6 }
 0x2f7   : > { %p1183_p12 = scmp.lt.s32.totalorder %s1181_s26, %s1177_s29 }
 0x2f8   : > { %p1179_p8 = pnand %p1178_p1, %p1541_p6 }
 0x2f9   : > { %p1184_p2 = por %p1183_p12, %p1182_p10 }
 0x2fa   : > { %p1180_p5 = pneg %p1179_p8 }
 0x2fc   : > { %p1185_p4 = pnand %p1184_p2, %p1180_p5 }
 0x2fe   : > { %1188 = shalt.err (!%p1185_p4)
}
 0x2ff   : > { %s1249_s10 = smov 64   ;;  %s1250_s7 = smov 4  }
 0x300   : > { %957 = dma.vmem_to_hbm [thread:$0]  (%p1541_p6), %s1470_s15, 128, %s1475_s8, %s706_s12, %s1249_s10, %s1249_s10, %s1250_s7  }
 0x301 PF: > { %p984_p11 = scmp.ge.s32.totalorder %s1235_s24, 2  ;;  %s734_s14 = sand.u32 1, %s1223_s21  }
 0x302   : > { %p1542_p13 = scmp.ne.s32.totalorder %s1529_s28, 0  ;;  %s735_s25 = scalar_lea.sflag [#allocation4], %s734_s14 }
 0x304   : > { %p974_p3 = pnand %p984_p11, %p1542_p13 }
 0x306   : > { %p975_p0 = pneg %p974_p3 }
 0x308   : > { %1218 = dma.done.wait (%p975_p0), %s735_s25, 128  }
 0x309   : > { %1220 = vsyncadd (%p975_p0), %s735_s25, 4294967168  ;;  %p21_p7 = scmp.ge.s32.totalorder %s1365_s9, 6   ;;  %s1543_s21 = smov %s1227_s22 }
 0x30a   : > { %s1544_s22 = smov %s1231_s23  ;;  %s1545_s23 = smov %s1375_s11 }
 0x30b   : > { %s1546_s24 = smov %s1365_s9  ;;  %23 = sbr.rel (!%p21_p7) target bundleno = 7 (0x7), region = 101 }
 0x310   :  { %740 = vsyncpa [#allocation3], 1 }
 0x311   :  { %742 = vsyncpa [#allocation3 + $0x1], 1 }
 0x312   :  { %743 = vsyncpa [#allocation6], 1 }
 0x313   :  { %744 = vsyncpa [#allocation9], 1 }
 0x314   :  { %745 = vsyncpa [#allocation4], 1 }
 0x315   :  { %747 = vsyncpa [#allocation4 + $0x1], 1 }

</bundles_post_ra>
